<compile_context>
chip_gen: v6e
topology: v6e:2x2x1
jax: 0.10.0
libtpu: 0.0.40
codegen_flags: <defaults>
</compile_context>

<pallas_src>
import functools

import jax
import jax.numpy as jnp
from jax.experimental import pallas as pl
from jax.experimental.pallas import tpu as pltpu


def _round_up(x, m):
    return ((x + m - 1) // m) * m


# ----------------------------- Pallas kernel -----------------------------------------

def _conv1d_bn_kernel(x_ref, halo_ref, w_ref, shift_ref, o_ref, *, k, stride, c_in, tl):
    """One (batch, L-tile, C_out-tile) grid step of conv1d + fused-BN, NCL layout.

    x_ref:     (1, stride*C_in, TL)     compute dtype  main (phase-decimated) input tile
    halo_ref:  (1, 1, stride*C_in, H)   compute dtype  right halo of the tile
    w_ref:     (TC, K*C_in)             compute dtype  BN-scale-folded weights, tap-major rows
    shift_ref: (TC, 1)                  float32        BN shift (beta - mean*scale)
    o_ref:     (1, TC, TL)              output dtype
    """
    # Glue the halo onto the main tile: (stride*C_in, TL + H), lanes = length axis.
    xcat = jnp.concatenate([x_ref[0], halo_ref[0, 0]], axis=-1)

    # Fold the K taps into one im2col slab (K*C_in, TL); K / stride / c_in are static
    # Python ints so every slice below is a static lane/sublane slice.
    pieces = []
    for t in range(k):
        phase = t % stride
        off = t // stride
        pieces.append(xcat[phase * c_in:(phase + 1) * c_in, off:off + tl])
    slab = pieces[0] if k == 1 else jnp.concatenate(pieces, axis=0)

    # Single MXU matmul with K*C_in contraction, f32 accumulation; lane-dense output.
    acc = jnp.dot(w_ref[...], slab, preferred_element_type=jnp.float32)   # (TC, TL) f32
    o_ref[0] = (acc + shift_ref[...]).astype(o_ref.dtype)


def rep_conv1d_bn_pallas(x_pad, weight, bn_scale, bn_shift, *, stride=1,
                         tile_l=512, compute_dtype=jnp.bfloat16):
    """Valid (already zero-padded) conv1d + fused BN in NCL layout.

    x_pad:   (N, C_in, L_pad)  float32 NCL input, already padded.
    weight:  (C_out, C_in, K)  conv weight (PyTorch layout).
    bn_scale, bn_shift: (C_out,) fused BN affine.
    """
    N, C_in, L_pad = x_pad.shape
    C_out, _, K = weight.shape
    S = int(stride)
    L_out = (L_pad - K) // S + 1
    assert L_out >= 1

    # ---- tile sizes ----
    TL = min(_round_up(tile_l, 128), _round_up(L_out, 128))   # lane tile, multiple of 128
    nL = -(-L_out // TL)
    TC = C_out if C_out <= 128 else 128                       # C_out tile (sublanes)
    C_out_p = _round_up(C_out, TC)
    nC = C_out_p // TC

    SC = S * C_in                                             # decimated channel count
    H = max((K - 1) // S, 1)                                  # halo width (>=1: never empty)
    assert H <= TL
    L_dec = nL * TL + H                                       # decimated length needed
    L_ext = L_dec * S                                         # raw length needed

    # ---- wrapper-side layout prep (cheap XLA glue; no full-tensor transposes) ----
    x_ext = jnp.pad(x_pad, ((0, 0), (0, 0), (0, L_ext - L_pad)))
    if S == 1:
        x_dec = x_ext                                         # (N, C_in, L_dec)
    else:
        # phase decimation: x_dec[n, p*C_in + c, j] = x_ext[n, c, j*S + p]
        x_dec = (x_ext.reshape(N, C_in, L_dec, S)
                 .transpose(0, 3, 1, 2).reshape(N, SC, L_dec))
    x_dec = x_dec.astype(compute_dtype)

    x_main = x_dec[:, :, :nL * TL]                            # (N, SC, nL*TL), blocked over L
    x_shift = x_dec[:, :, TL:]
    x_shift = jnp.pad(x_shift, ((0, 0), (0, 0), (0, nL * TL - x_shift.shape[2])))
    halo = (x_shift.reshape(N, SC, nL, TL)[:, :, :, :H]
            .transpose(0, 2, 1, 3))                           # (N, nL, SC, H)  (tiny)

    # Fold BN scale into weights; rows tap-major so they match the in-kernel slab order.
    w2 = (weight * bn_scale[:, None, None]).transpose(0, 2, 1).reshape(C_out, K * C_in)
    shift = bn_shift
    if C_out_p > C_out:
        w2 = jnp.pad(w2, ((0, C_out_p - C_out), (0, 0)))
        shift = jnp.pad(shift, (0, C_out_p - C_out))
    w2 = w2.astype(compute_dtype)
    shift2 = shift.reshape(C_out_p, 1).astype(jnp.float32)

    # ---- VMEM budget (sized for v7x's 64 MiB physical / 32 MiB default scoped) ----
    cb = jnp.dtype(compute_dtype).itemsize
    ob = jnp.dtype(x_pad.dtype).itemsize
    per_step = (SC * TL * cb + SC * H * cb + TC * K * C_in * cb + TC * 4 + TC * TL * ob)
    vmem_limit = int(min(48 * 1024 * 1024, max(16 * 1024 * 1024, 6 * per_step)))

    kernel = functools.partial(_conv1d_bn_kernel, k=K, stride=S, c_in=C_in, tl=TL)
    out = pl.pallas_call(
        kernel,
        out_shape=jax.ShapeDtypeStruct((N, C_out_p, nL * TL), x_pad.dtype),
        grid=(N, nL, nC),
        in_specs=[
            pl.BlockSpec((1, SC, TL), lambda n, l, c: (n, 0, l)),
            pl.BlockSpec((1, 1, SC, H), lambda n, l, c: (n, l, 0, 0)),
            pl.BlockSpec((TC, K * C_in), lambda n, l, c: (c, 0)),
            pl.BlockSpec((TC, 1), lambda n, l, c: (c, 0)),
        ],
        out_specs=pl.BlockSpec((1, TC, TL), lambda n, l, c: (n, c, l)),
        compiler_params=pltpu.CompilerParams(
            dimension_semantics=("parallel", "parallel", "parallel"),
            vmem_limit_bytes=vmem_limit),
    )(x_main, halo, w2, shift2)

    return out[:, :C_out, :L_out]


# ----------------------------- Module replica ----------------------------------------

class RepConv1dBranchPallas:
    def __init__(self, key, in_channels, out_channels, kernel_size, k,
                 stride=1, padding=0, groups=1, bias=False,
                 tile_l=512, compute_dtype=jnp.bfloat16):
        assert padding in ((kernel_size - 1) // 2, 0), 'Only support SAME/ZERO padding now.'
        assert kernel_size % 2 == 1
        assert groups == 1  # TODO(synk): grouped conv (groups > 1) not implemented in the Pallas kernel
        self.kernel_size = kernel_size
        self.k = k
        self.stride = stride
        self.padding = padding
        self.tile_l = tile_l
        self.compute_dtype = compute_dtype

        # Resolve the branch configuration exactly as RepConv1dBranch.__init__ does.
        if kernel_size == k:
            eff_k, branch_pad, comp_pad = kernel_size, padding, False
        elif k == 0:
            eff_k, branch_pad, comp_pad = 1, 0, False
        elif k % 2 == 0:
            eff_k = k
            if padding == 0:
                branch_pad, comp_pad = 0, False
            else:
                branch_pad, comp_pad = 0, True   # CompensatePad1D(k) + valid conv
        else:
            eff_k = k
            branch_pad = (k - 1) // 2 if padding != 0 else 0
            comp_pad = False
        self.eff_k, self.branch_pad, self.comp_pad = eff_k, branch_pad, comp_pad

        # init_weights(): uniform(-conv_max, conv_max), conv_max = max(k, 1) ** -0.5
        conv_max = max(k, 1) ** (-0.5)
        self.weight = jax.random.uniform(
            key, (out_channels, in_channels // groups, eff_k),
            minval=-conv_max, maxval=conv_max, dtype=jnp.float32)

        # BatchNorm1d(out_channels), eval/deployment mode, freshly initialized statistics.
        eps = 1e-5
        gamma = jnp.ones((out_channels,), jnp.float32)
        beta = jnp.zeros((out_channels,), jnp.float32)
        running_mean = jnp.zeros((out_channels,), jnp.float32)
        running_var = jnp.ones((out_channels,), jnp.float32)
        self.bn_scale = gamma / jnp.sqrt(running_var + eps)
        self.bn_shift = beta - running_mean * self.bn_scale

    # ---- glue that mirrors RepConv1dBranch.forward (slicing + padding), NCL layout ----
    def _preprocess(self, x_ncl):
        ks, k = self.kernel_size, self.k
        if ks == k:
            x_in = x_ncl
        elif self.padding == 0:
            if k != 0 and k % 2 == 0:
                ml = (ks - k) // 2
                mr = ml + 1
                x_in = x_ncl[:, :, ml:-mr]
            else:
                m = (ks - k) // 2
                x_in = x_ncl[:, :, m:-m]
        else:
            x_in = x_ncl
        # Explicit zero-padding (branch conv padding or CompensatePad1D).
        if self.comp_pad:
            lpad, rpad = self.eff_k // 2, (self.eff_k - 1) // 2
        else:
            lpad = rpad = self.branch_pad
        return jnp.pad(x_in, ((0, 0), (0, 0), (lpad, rpad)))

    def __call__(self, x_ncl):
        x_pad = self._preprocess(x_ncl)
        return rep_conv1d_bn_pallas(x_pad, self.weight, self.bn_scale, self.bn_shift,
                                    stride=self.stride, tile_l=self.tile_l,
                                    compute_dtype=self.compute_dtype)

    # ---- pure-JAX reference (same compute dtype, no Pallas) for correctness checking ----
    def reference(self, x_ncl):
        x_pad = self._preprocess(x_ncl)
        N, C_in, L_pad = x_pad.shape
        C_out, _, K = self.weight.shape
        S = self.stride
        L_out = (L_pad - K) // S + 1
        w2 = ((self.weight * self.bn_scale[:, None, None])
              .transpose(0, 2, 1).reshape(C_out, K * C_in)).astype(self.compute_dtype)
        cols = jnp.stack(
            [x_pad[:, :, t:t + (L_out - 1) * S + 1:S] for t in range(K)], axis=1)
        cols = cols.reshape(N, K * C_in, L_out).astype(self.compute_dtype)
        y = jnp.einsum('oc,ncl->nol', w2, cols, preferred_element_type=jnp.float32)
        y = y + self.bn_shift[None, :, None]
        return y.astype(x_ncl.dtype)


# ----------------------------- demo --------------------------------------------------

if __name__ == "__main__":
    key = jax.random.PRNGKey(0)
    k_w, k_x = jax.random.split(key)

    # Small shapes consistent with the module: batch=2, in_ch=4, out_ch=8, seq=16.
    # Config: kernel_size=7, sub-kernel k=3, SAME padding=3, stride=1, groups=1
    #   -> branch = Conv1d(k=3, padding=1, bias=False) + BatchNorm1d.
    N, C_in, C_out, L = 2, 4, 8, 16
    kernel_size, k, stride, padding = 7, 3, 1, 3

    mod = RepConv1dBranchPallas(k_w, C_in, C_out, kernel_size, k,
                                stride=stride, padding=padding, groups=1)
    x = jax.random.normal(k_x, (N, C_in, L), dtype=jnp.float32)   # NCL, like nn.Conv1d

    out = jax.block_until_ready(mod(x))
    assert out.shape == (N, C_out, L), out.shape

    ref = mod.reference(x)
    max_err = float(jnp.max(jnp.abs(out - ref)))
    assert jnp.allclose(out, ref, atol=2e-3, rtol=2e-3), max_err

    print("KERNEL_OK")
</pallas_src>

<mosaic_0001>
module attributes {stable_mosaic.version = 11 : i64} {
  func.func @_conv1d_bn_kernel(%arg0: i32, %arg1: i32, %arg2: i32, %arg3: memref<1x4x128xbf16, #tpu.memory_space<vmem>>, %arg4: memref<1x1x4x2xbf16, #tpu.memory_space<vmem>>, %arg5: memref<8x12xbf16, #tpu.memory_space<vmem>>, %arg6: memref<8x1xf32, #tpu.memory_space<vmem>>, %arg7: memref<1x8x128xf32, #tpu.memory_space<vmem>>) attributes {dimension_semantics = [#tpu.dimension_semantics<parallel>, #tpu.dimension_semantics<parallel>, #tpu.dimension_semantics<parallel>], iteration_bounds = array<i64: 2, 1, 1>, scalar_prefetch = 0 : i64, scratch_operands = 0 : i64, tpu.core_type = #tpu.core_type<tc>, window_params = [{transform_indices = @transform_0, window_bounds = array<i64: 1, 4, 128>}, {transform_indices = @transform_1, window_bounds = array<i64: 1, 1, 4, 2>}, {transform_indices = @transform_2, window_bounds = array<i64: 8, 12>}, {transform_indices = @transform_3, window_bounds = array<i64: 8, 1>}, {transform_indices = @transform_4, window_bounds = array<i64: 1, 8, 128>}]} {
    %c0 = arith.constant 0 : index
    %c0_0 = arith.constant 0 : index
    %c0_1 = arith.constant 0 : index
    %0 = vector.load %arg3[%c0, %c0_0, %c0_1] : memref<1x4x128xbf16, #tpu.memory_space<vmem>>, vector<1x4x128xbf16>
    %1 = vector.shape_cast %0 : vector<1x4x128xbf16> to vector<4x128xbf16>
    %c0_2 = arith.constant 0 : index
    %c0_3 = arith.constant 0 : index
    %c0_4 = arith.constant 0 : index
    %c0_5 = arith.constant 0 : index
    %2 = vector.load %arg4[%c0_2, %c0_3, %c0_4, %c0_5] : memref<1x1x4x2xbf16, #tpu.memory_space<vmem>>, vector<1x1x4x2xbf16>
    %3 = vector.shape_cast %2 : vector<1x1x4x2xbf16> to vector<4x2xbf16>
    %4 = tpu.concatenate %1, %3 in 1 : vector<4x128xbf16>, vector<4x2xbf16> -> vector<4x130xbf16>
    %5 = vector.extract_strided_slice %4 {offsets = [0, 0], sizes = [4, 128], strides = [1, 1]} : vector<4x130xbf16> to vector<4x128xbf16>
    %6 = vector.extract_strided_slice %4 {offsets = [0, 1], sizes = [4, 128], strides = [1, 1]} : vector<4x130xbf16> to vector<4x128xbf16>
    %7 = vector.extract_strided_slice %4 {offsets = [0, 2], sizes = [4, 128], strides = [1, 1]} : vector<4x130xbf16> to vector<4x128xbf16>
    %8 = tpu.concatenate %5, %6, %7 in 0 : vector<4x128xbf16>, vector<4x128xbf16>, vector<4x128xbf16> -> vector<12x128xbf16>
    %c0_6 = arith.constant 0 : index
    %c0_7 = arith.constant 0 : index
    %9 = vector.load %arg5[%c0_6, %c0_7] : memref<8x12xbf16, #tpu.memory_space<vmem>>, vector<8x12xbf16>
    %cst = arith.constant dense<0.000000e+00> : vector<8x128xf32>
    %10 = tpu.matmul %9, %8, %cst {dimension_numbers = #tpu.dot_dimension_numbers<[1], [0], [0], [1], [0, 0, 1, 1], [], []>} : vector<8x12xbf16>, vector<12x128xbf16>, vector<8x128xf32> -> vector<8x128xf32>
    %c0_8 = arith.constant 0 : index
    %c0_9 = arith.constant 0 : index
    %11 = vector.load %arg6[%c0_8, %c0_9] : memref<8x1xf32, #tpu.memory_space<vmem>>, vector<8x1xf32>
    %12 = vector.broadcast %11 : vector<8x1xf32> to vector<8x128xf32>
    %13 = arith.addf %10, %12 : vector<8x128xf32>
    %c0_10 = arith.constant 0 : index
    %c0_11 = arith.constant 0 : index
    %c0_12 = arith.constant 0 : index
    %14 = vector.load %arg7[%c0_10, %c0_11, %c0_12] : memref<1x8x128xf32, #tpu.memory_space<vmem>>, vector<1x8x128xf32>
    %15 = vector.shape_cast %14 : vector<1x8x128xf32> to vector<8x128xf32>
    %16 = vector.shape_cast %13 : vector<8x128xf32> to vector<1x8x128xf32>
    tpu.vector_store %arg7[%c0_10, %c0_11, %c0_12], %16 {strides = array<i32>} : memref<1x8x128xf32, #tpu.memory_space<vmem>>, vector<1x8x128xf32>,
    return
  }
  func.func @transform_0(%arg0: i32, %arg1: i32, %arg2: i32) -> (i32, i32, i32) {
    %c0_i32 = arith.constant 0 : i32
    %c0_i32_0 = arith.constant 0 : i32
    return %arg0, %c0_i32, %arg1 : i32, i32, i32
  }
  func.func @transform_1(%arg0: i32, %arg1: i32, %arg2: i32) -> (i32, i32, i32, i32) {
    %c0_i32 = arith.constant 0 : i32
    %c0_i32_0 = arith.constant 0 : i32
    %c0_i32_1 = arith.constant 0 : i32
    return %arg0, %arg1, %c0_i32, %c0_i32_0 : i32, i32, i32, i32
  }
  func.func @transform_2(%arg0: i32, %arg1: i32, %arg2: i32) -> (i32, i32) {
    %c0_i32 = arith.constant 0 : i32
    %c0_i32_0 = arith.constant 0 : i32
    return %arg2, %c0_i32 : i32, i32
  }
  func.func @transform_3(%arg0: i32, %arg1: i32, %arg2: i32) -> (i32, i32) {
    %c0_i32 = arith.constant 0 : i32
    %c0_i32_0 = arith.constant 0 : i32
    return %arg2, %c0_i32 : i32, i32
  }
  func.func @transform_4(%arg0: i32, %arg1: i32, %arg2: i32) -> (i32, i32, i32) {
    %c0_i32 = arith.constant 0 : i32
    return %arg0, %arg2, %arg1 : i32, i32, i32
  }
}

</mosaic_0001>

<bundles_post_ra>
// kernel: tpu_custom_call.1
= control target key start
LH: loop header
LB: loop body
LE: loop exit
PB: predicated region body
PF: predicated region fallthrough
CT: control target
= control target key end

     0   :  { %9 = vsyncpa [#allocation3], 0  ;;  %s821_s0 = inlined_call_operand.vmem [shape: bf16[2,4,128], index: 0, kind: input, shape index: {}]   ;;  %s822_s1 = inlined_call_operand.vmem [shape: bf16[2,1,4,2], index: 1, kind: input, shape index: {}]   ;;  %s823_s2 = inlined_call_operand.vmem [shape: bf16[8,12], index: 2, kind: input, shape index: {}]   ;;  %s824_s3 = inlined_call_operand.vmem [shape: f32[8,1], index: 3, kind: input, shape index: {}]   ;;  %s825_s4 = inlined_call_operand.hbm [shape: f32[2,8,128], index: 4, kind: output, shape index: {}]  }
   0x1   :  { %11 = vsyncpa [#allocation3 + $0x1], 0  ;;  %s701_s15 = smov 0   ;;  %s703_s16 = smov 0  }
   0x2   :  { %s705_s17 = smov 0   ;;  %s707_s18 = smov 0  }
   0x3   :  { %s709_s19 = smov 0   ;;  %s711_s20 = smov 0  }
   0x4 LB: > { %s508_s21 = sadd.s32 4294967295, %s668_s20   ;;  %s509_s22 = sadd.s32 4294967294, %s668_s20   ;;  %s668_s20 = sphi %s711_s20, %s17_s20   ;;  %s664_s19 = sphi %s709_s19, %s832_s19   ;;  %s660_s18 = sphi %s707_s18, %s831_s18   ;;  %s656_s17 = sphi %s705_s17, %s830_s17   ;;  %s652_s16 = sphi %s703_s16, %s829_s16   ;;  %s648_s15 = sphi %s701_s15, %s828_s15  }
   0x5   : > { %s36_s23 = sadd.s32 1, %s664_s19  ;;  %s155_s24 = sadd.s32 1, %s656_s17 }
   0x6   : > { %p38_p0 = scmp.ge.s32.totalorder %s36_s23, 2  ;;  %p165_p1 = scmp.ne.s32.totalorder %s656_s17, %s652_s16 }
   0x7   : > { %p166_p2 = scmp.eq.s32.totalorder %s508_s21, 1  ;;  %p171_p3 = scmp.ne.s32.totalorder %s652_s16, %s648_s15 }
   0x8   : > { %s834_s23 = smov (%p38_p0, %s36_s23), 0  ;;  %p172_p5 = scmp.eq.s32.totalorder %s509_s22, 1 }
   0x9   : > { %p741_p4 = por %p166_p2, %p165_p1  ;;  %s148_s26 = ssub.s32 %s664_s19, %s834_s23 }
   0xa   : > { %p514_p6 = scmp.ge.s32.totalorder %s668_s20, 1  ;;  %p153_p7 = scmp.eq.s32.totalorder %s148_s26, 0 }
   0xb   : > { %p748_p8 = por %p172_p5, %p171_p3  ;;  %p224_p9 = scmp.lt.s32.totalorder %s668_s20, 3 }
   0xc   : > { %s754_s28 = scalar_select %p153_p7, %s656_s17, %s155_s24  }
   0xd   : > { %p225_p10 = pnand %p514_p6, %p224_p9 }
   0xe   : > { %p267_p11 = scmp.lt.s32.totalorder (!%p225_p10), %s660_s18, 1  ;;  %s672_s11 = smov (!%p225_p10), 126  }
   0xf   : > { %228 = sbr.rel (%p225_p10) target bundleno = 362 (0x16a), region = 36  ;;  %s673_s12 = smov (!%p225_p10), 127  }
  0x10   : > { %s264_s24 = sand.u32 (!%p225_p10), 1, %s652_s16  }
  0x11   : > { %s515_s26 = sshll.u32 (!%p225_p10), %s264_s24, 3  ;;  %s373_s9 = scalar_lea.sflag (!%p225_p10), [#allocation3], %s264_s24 }
  0x14   : > { %v670_v0 = vmov 0.0   ;;  %s268_s29 = scalar_select %p267_p11, %s660_s18, 1  ;;  %vm671_vm0 = vmmov 0   ;;  %v674_v7 = vmov 0   ;;  %v318_v8 = vld [vmem:[%s824_s3] sm:$0xff]  ;;  %vm308_vm1 = vcmask 1031168  }
  0x15   : > { %525 = vmatprep.subr.bf16.mxu0 %v670_v0  ;;  %527 = vmatprep.mubr.msk.bf16.mxu0 %vm671_vm0, %v670_v0  ;;  %vm300_vm2 = vcmask 1039360   ;;  %vm310_vm3 = vcmask 1041408   ;;  %vm314_vm4 = vcmask 1043456   ;;  %vm328_vm5 = vcmask 1045504   ;;  %v317_v18 = vld [vmem:[%s823_s2] sm:$0xf] }
  0x16   : > { %s516_s30 = sshll.u32 %s268_s29, 1  ;;  %591 = vset.pattern.permute.xlu0 %v674_v7  ;;  %vm324_vm6 = vcmask 97280   ;;  %s520_s29 = sshll.u32 %s660_s18, 7 }
  0x17   : > { %s273_s7 = scalar_lea.vmem %s821_s0, %s516_s30  ;;  %s280_s10 = scalar_lea.vmem %s822_s1, %s516_s30 }
  0x18   : > { %v290_v1 = vld [vmem:[%s273_s7] sm:$0x3]  ;;  %s266_s30 = scalar_lea.vmem [#allocation2], %s515_s26  ;;  %s775_s8 = scalar_lea.hbm %s825_s4, %s520_s29 }
  0x19   : > { %v291_v2 = vld [vmem:[%s280_s10] sm:$0x3]  ;;  %v302_v3 = vrot.slane %v290_v1, 4  ;;  %v294_v4 = vrot.slane %v290_v1, 6  ;;  %s388_s5 = sshll.u32 %s266_s30, 4  ;;  %s675_s18 = smov [#allocation2]   ;;  %s777_s5 = int_to_ptr.vmem [resolvable:$true] %s388_s5 }
  0x1a   : > { %v303_v5 = vrot.slane %v291_v2, 4  ;;  %v295_v6 = vrot.slane %v291_v2, 6  ;;  %s592_s10 = scalar_lea.vmem %s777_s5, 128 }
  0x1b   : > { %304 = vrot.lane.b32.xlu1 %v302_v3, %s672_s11  ;;  %296 = vrot.lane.b32.xlu0 %v294_v4, %s673_s12  ;;  %p593_p12 = scmp.ne.s32.totalorder %s777_s5, %s592_s10 }
  0x1d   : > { %p594_p13 = pnand %p593_p12, %p741_p4 }
  0x1f   : > { %306 = vrot.lane.b32.xlu1 %v303_v5, %s672_s11  ;;  %298 = vrot.lane.b32.xlu0 %v295_v6, %s673_s12  ;;  %p595_p0 = pneg %p594_p13  ;;  %s596_s11 = sshll.u32 %s675_s18, 4  ;;  %s597_s11 = int_to_ptr.vmem [resolvable:$false] %s596_s11 }
  0x20   : > { %s598_s12 = scalar_lea.vmem %s597_s11, 256  ;;  %p599_p1 = scmp.lt.s32.totalorder %s777_s5, %s597_s11 }
  0x21   : > { %p600_p2 = scmp.lt.s32.totalorder %s598_s12, %s592_s10 }
  0x23   : > { %321 = vperm.xlu0 %591, %v318_v8   ;;  %p601_p3 = por %p600_p2, %p599_p1 }
  0x25   : > { %p602_p5 = pnand %p601_p3, %p595_p0 }
  0x8d   : > { %v305_v9 = vpop.permute.xlu1 %304  ;;  %v297_v10 = vpop.permute.xlu0 %296 }
  0x91   : > { %v307_v11 = vpop.permute.xlu1 %306  ;;  %v299_v12 = vpop.permute.xlu0 %298 }
  0x92   : > { %v309_v13 = vsel %vm308_vm1, %v305_v9, %v307_v11  ;;  %v301_v14 = vsel %vm300_vm2, %v297_v10, %v299_v12 }
  0x93   : > { %v313_v15 = vsel %vm310_vm3, %v290_v1, %v301_v14 }
  0x94   : > { %v316_v16 = vsel %vm314_vm4, %v313_v15, %v309_v13 }
  0x95   : > { %v329_v17 = vsel %vm328_vm5, %v316_v16, 0 }
  0x96   : > { %526 = vmatpush3.bf16.msra.mxu0 %v329_v17 }
  0x99   : > { %528 = vmatmul.mubr.msk.bf16.vlgmr.msra.gmra.mxu0 %vm324_vm6, %v317_v18 }
  0x9e   : > { %v322_v19 = vpop.permute.xlu0 %321 }
 0x159   : > { %v365_v20 = vpop.f32.mrf.mxu0 }
 0x15a   : > { %v366_v21 = vadd.f32 %v365_v20, %v322_v19 }
 0x15b   : > { %v529_v22 = vpop.f32.mrf.mxu0 }
 0x15c   : > { %371 = vst [vmem:[%s266_s30] sm:$0xff] %v366_v21 }
 0x15d   : > { %v368_v23 = vpop.f32.mrf.mxu0 }
 0x15e   : > { %605 = shalt.err (!%p602_p5)
}
 0x15f   : > { %s606_s13 = scalar_lea.hbm %s775_s8, 128  ;;  %s610_s22 = scalar_lea.hbm %s825_s4, 256 }
 0x160   : > { %p607_p6 = scmp.ne.s32.totalorder %s775_s8, %s606_s13  ;;  %p611_p10 = scmp.lt.s32.totalorder %s775_s8, %s825_s4 }
 0x161   : > { %p612_p11 = scmp.lt.s32.totalorder %s610_s22, %s606_s13 }
 0x162   : > { %p608_p7 = pnand %p607_p6, %p741_p4 }
 0x163   : > { %p613_p12 = por %p612_p11, %p611_p10 }
 0x164   : > { %p609_p9 = pneg %p608_p7 }
 0x166   : > { %p614_p13 = pnand %p613_p12, %p609_p9 }
 0x168   : > { %617 = shalt.err (!%p614_p13)
}
 0x169   : > { %531 = dma.vmem_to_hbm [thread:$0]  (%p741_p4), %s777_s5, 128, %s775_s8, %s373_s9   ;;  %v530_v24 = vpop.f32.mrf.mxu0 }
 0x16a PF: > { %p537_p0 = scmp.ge.s32.totalorder %s668_s20, 2  ;;  %s400_s29 = sand.u32 1, %s648_s15  }
 0x16b   : > { %s401_s30 = scalar_lea.sflag [#allocation3], %s400_s29 }
 0x16c   : > { %p534_p1 = pnand %p537_p0, %p748_p8 }
 0x16e   : > { %p535_p2 = pneg %p534_p1 }
 0x170   : > { %643 = dma.done.wait (%p535_p2), %s401_s30, 128  }
 0x171   : > { %645 = vsyncadd (%p535_p2), %s401_s30, 4294967168  ;;  %s17_s20 = sadd.s32 1, %s668_s20   ;;  %s828_s15 = smov %s652_s16 }
 0x172   : > { %p14_p3 = scmp.ge.s32.totalorder %s17_s20, 4   ;;  %s829_s16 = smov %s656_s17 }
 0x173   : > { %s830_s17 = smov %s754_s28  ;;  %s831_s18 = smov %s664_s19 }
 0x174   : > { %s832_s19 = smov %s834_s23  ;;  %16 = sbr.rel (!%p14_p3) target bundleno = 4 (0x4), region = 80 }
 0x179   :  { %406 = vsyncpa [#allocation3], 1 }
 0x17a   :  { %408 = vsyncpa [#allocation3 + $0x1], 1 }

</bundles_post_ra>
